<compile_context>
chip_gen: v5e
topology: v5e:2x2
jax: 0.10.0
libtpu: 0.0.40
codegen_flags: <defaults>
</compile_context>

<pallas_src>
import math
from functools import partial

import jax
import jax.numpy as jnp
from jax.experimental import pallas as pl
from jax.experimental.pallas import tpu as pltpu

# MXU operand / HBM weight dtype.  bf16 operands give ~2-4x MXU throughput and
# halve weight HBM traffic / VMEM footprint; accumulation stays f32.  Set to
# jnp.float32 to match the PyTorch f32 reference bit-for-bit (slower).
MXU_DTYPE = jnp.bfloat16


def _mm(a, b):
    return jnp.dot(a.astype(MXU_DTYPE), b.astype(MXU_DTYPE),
                   preferred_element_type=jnp.float32)


def _qkt(q, k):
    # q @ k.T without an explicit XLU transpose.
    return jax.lax.dot_general(
        q.astype(MXU_DTYPE), k.astype(MXU_DTYPE),
        (((1,), (1,)), ((), ())), preferred_element_type=jnp.float32)


def _layer_norm(x, gamma, beta, eps=1e-5):
    mean = jnp.mean(x, axis=-1, keepdims=True)
    cent = x - mean
    var = jnp.mean(cent * cent, axis=-1, keepdims=True)
    return gamma * (cent * jax.lax.rsqrt(var + eps)) + beta


# ----------------------------- fused kernel ---------------------------------


def _encoder_kernel(x_ref, wqkv_ref, wout_ref, w1_ref, w2_ref, vec_ref,
                    out_ref, head_scratch,
                    *, num_heads, head_dim, d_model, ffn_hidden,
                    seq_len, batch_tile):
    """Grid = (batch_tile_idx, layer).  One EncoderLayer for Bt batch rows.

    x_ref        (Bt*S, D)    encoder input rows (read only at layer 0)
    wqkv_ref     (1, D, 3D)   qkv weights for layer l, columns [Q|K|V] (bf16)
    wout_ref     (1, D, D)    attention output projection (bf16)
    w1_ref       (1, D, Hf)   FFN first linear (bf16)
    w2_ref       (1, Hf, D)   FFN second linear (bf16)
    vec_ref      (1, 8, P)    packed biases / LayerNorm params (f32, padded)
    out_ref      (Bt*S, D)    resident activation carry across the layer axis
    head_scratch (H*S, hd)    f32 VMEM scratch for the per-head outputs
    """
    layer = pl.program_id(1)
    S, D, hd = seq_len, d_model, head_dim
    H, Hf, Bt = num_heads, ffn_hidden, batch_tile

    # Layer 0: seed the resident activation with the encoder input.
    @pl.when(layer == 0)
    def _():
        out_ref[...] = x_ref[...]

    act = out_ref[...]                                   # (Bt*S, D) f32
    vec = vec_ref[0]                                     # (8, P)  f32
    b_qkv = vec[0:1, :3 * D]
    b_out = vec[1:2, :D]
    g1, be1 = vec[2:3, :D], vec[3:4, :D]
    b1 = vec[4:5, :Hf]
    b2, g2, be2 = vec[5:6, :D], vec[6:7, :D], vec[7:8, :D]

    # ---- multi-head self-attention ------------------------------------------
    # One fused QKV projection over the whole batch tile (lane-dense, MXU).
    qkv = _mm(act, wqkv_ref[0]) + b_qkv                  # (Bt*S, 3D) f32
    q_all = qkv[:, :D]
    k_all = qkv[:, D:2 * D]
    v_all = qkv[:, 2 * D:3 * D]

    scale = 1.0 / math.sqrt(hd)
    vals_rows = []
    for bi in range(Bt):                                 # static unroll, Bt small
        r0 = bi * S
        for h in range(H):                               # static unroll, H small
            c0 = h * hd
            q = q_all[r0:r0 + S, c0:c0 + hd]
            k = k_all[r0:r0 + S, c0:c0 + hd]
            v = v_all[r0:r0 + S, c0:c0 + hd]
            s = _qkt(q, k) * scale                       # (S, S) f32
            s = s - jnp.max(s, axis=-1, keepdims=True)
            e = jnp.exp(s)
            attn = e * pl.reciprocal(jnp.sum(e, axis=-1, keepdims=True),
                                     approx=True)
            head_scratch[h * S:(h + 1) * S, :] = _mm(attn, v)   # (S, hd)
        # Reproduce values.reshape(B, S, H*hd) applied to a (B, H, S, hd)
        # tensor (row-major flatten, NO head/seq transpose, as in the ref):
        #   vals[s, hp*hd + d] = stacked[s*H + hp, d]
        # i.e. column chunk hp of vals is the stride-H row slice of the
        # (H*S, hd) scratch starting at row hp.  Exact, zero MXU FLOPs.
        chunks = [head_scratch[pl.ds(hp, S, stride=H), :] for hp in range(H)]
        vals_rows.append(jnp.concatenate(chunks, axis=-1))      # (S, D)
    vals = jnp.concatenate(vals_rows, axis=0) if Bt > 1 else vals_rows[0]

    # ---- out-proj + residual + LN + FFN + residual + LN ----------------------
    attn_out = _mm(vals, wout_ref[0]) + b_out
    # dropout1: identity at inference
    x1 = _layer_norm(attn_out + act, g1, be1)
    hmid = jnp.maximum(_mm(x1, w1_ref[0]) + b1, 0.0)
    # dropout (inside FFN) and dropout2: identity at inference
    ffn = _mm(hmid, w2_ref[0]) + b2
    out_ref[...] = _layer_norm(ffn + x1, g2, be2)


# ----------------------------- wrapper ---------------------------------------


def _pick_batch_tile(batch):
    """Largest divisor Bt of `batch` that still leaves >=2 parallel blocks
    (keeps both v7x TensorCores busy); falls back to 1."""
    if batch <= 1:
        return 1
    best = 1
    for bt in range(1, batch + 1):
        if batch % bt == 0 and batch // bt >= 2:
            best = bt
    return best


def encoder_forward(x, packed, num_heads, batch_tile=None, vmem_limit_bytes=None):
    B, S, D = x.shape
    L = packed["w_qkv"].shape[0]
    Hf = packed["w1"].shape[2]
    P = packed["vecs"].shape[2]
    hd = D // num_heads

    Bt = batch_tile if batch_tile is not None else _pick_batch_tile(B)
    assert B % Bt == 0
    nb = B // Bt

    # Flatten (B, S, D) -> (B*S, D) host-side so all in-kernel matmuls run on a
    # lane-dense 2-D slab; restored at the end.
    x2d = x.reshape(B * S, D)

    kernel = partial(_encoder_kernel, num_heads=num_heads, head_dim=hd,
                     d_model=D, ffn_hidden=Hf, seq_len=S, batch_tile=Bt)

    # Advisory cost hint for the XLA scheduler around the fused call.
    flops_step = (2 * Bt * S * D * (3 * D)                 # qkv projection
                  + Bt * num_heads * 2 * (2 * S * S * hd)  # scores + attn@v
                  + 2 * Bt * S * D * D                     # out projection
                  + 2 * 2 * Bt * S * D * Hf)               # ffn (two matmuls)
    weight_bytes = sum(int(packed[k].nbytes)
                       for k in ("w_qkv", "w_out", "w1", "w2", "vecs"))
    cost = pl.CostEstimate(
        flops=nb * L * flops_step,
        transcendentals=nb * L * Bt * (num_heads * S * S + num_heads * S + 2 * S),
        bytes_accessed=2 * B * S * D * 4 + nb * weight_bytes)

    out2d = pl.pallas_call(
        kernel,
        out_shape=jax.ShapeDtypeStruct((B * S, D), jnp.float32),
        grid=(nb, L),
        in_specs=[
            pl.BlockSpec((Bt * S, D), lambda b, l: (b, 0)),
            pl.BlockSpec((1, D, 3 * D), lambda b, l: (l, 0, 0)),
            pl.BlockSpec((1, D, D), lambda b, l: (l, 0, 0)),
            pl.BlockSpec((1, D, Hf), lambda b, l: (l, 0, 0)),
            pl.BlockSpec((1, Hf, D), lambda b, l: (l, 0, 0)),
            pl.BlockSpec((1, 8, P), lambda b, l: (l, 0, 0)),
        ],
        out_specs=pl.BlockSpec((Bt * S, D), lambda b, l: (b, 0)),
        scratch_shapes=[pltpu.VMEM((num_heads * S, hd), jnp.float32)],
        input_output_aliases={0: 0},          # run in-place in HBM (x donated)
        compiler_params=pltpu.CompilerParams(
            dimension_semantics=("parallel", "arbitrary"),
            vmem_limit_bytes=vmem_limit_bytes),
        cost_estimate=cost,
    )(x2d, packed["w_qkv"], packed["w_out"], packed["w1"], packed["w2"],
      packed["vecs"])
    return out2d.reshape(B, S, D)


# ----------------------------- parameters ------------------------------------


def _linear_init(key, fan_in, fan_out):
    # nn.Linear-style init; stored as (in, out) so the kernel computes x @ W + b.
    k1, k2 = jax.random.split(key)
    bound = 1.0 / math.sqrt(fan_in)
    w = jax.random.uniform(k1, (fan_in, fan_out), jnp.float32, -bound, bound)
    b = jax.random.uniform(k2, (fan_out,), jnp.float32, -bound, bound)
    return w, b


def init_encoder_params(key, d_model, ffn_hidden, num_layers):
    params = []
    for _ in range(num_layers):
        key, k1, k2, k3, k4 = jax.random.split(key, 5)
        w_qkv, b_qkv = _linear_init(k1, d_model, 3 * d_model)
        w_out, b_out = _linear_init(k2, d_model, d_model)
        w1, b1 = _linear_init(k3, d_model, ffn_hidden)
        w2, b2 = _linear_init(k4, ffn_hidden, d_model)
        params.append(dict(
            w_qkv=w_qkv, b_qkv=b_qkv, w_out=w_out, b_out=b_out,
            gamma1=jnp.ones((d_model,), jnp.float32),
            beta1=jnp.zeros((d_model,), jnp.float32),
            w1=w1, b1=b1, w2=w2, b2=b2,
            gamma2=jnp.ones((d_model,), jnp.float32),
            beta2=jnp.zeros((d_model,), jnp.float32),
        ))
    return params


def _reorder_qkv(w_qkv, b_qkv, num_heads, head_dim):
    """Column order [h][q|k|v][d] (PyTorch qkv_layer + per-head chunk) ->
    [q|k|v][h][d] so Q/K/V are three contiguous D-wide blocks in the kernel."""
    D = w_qkv.shape[0]
    w = (w_qkv.reshape(D, num_heads, 3, head_dim)
              .transpose(0, 2, 1, 3).reshape(D, 3 * D))
    b = (b_qkv.reshape(num_heads, 3, head_dim)
              .transpose(1, 0, 2).reshape(3 * D))
    return w, b


def pack_encoder_params(layer_params, num_heads, d_model, ffn_hidden):
    """Stack per-layer params along a leading layer axis (weights stored in
    MXU_DTYPE, e.g. bf16); pack the small bias/gamma/beta vectors into one
    (8, P) f32 array per layer (one DMA instead of eight)."""
    head_dim = d_model // num_heads
    P = max(3 * d_model, ffn_hidden, d_model)
    w_qkv, w_out, w1, w2, vecs = [], [], [], [], []
    for p in layer_params:
        wq, bq = _reorder_qkv(p["w_qkv"], p["b_qkv"], num_heads, head_dim)
        w_qkv.append(wq)
        w_out.append(p["w_out"])
        w1.append(p["w1"])
        w2.append(p["w2"])
        vec = jnp.zeros((8, P), jnp.float32)
        vec = vec.at[0, :3 * d_model].set(bq)
        vec = vec.at[1, :d_model].set(p["b_out"])
        vec = vec.at[2, :d_model].set(p["gamma1"])
        vec = vec.at[3, :d_model].set(p["beta1"])
        vec = vec.at[4, :ffn_hidden].set(p["b1"])
        vec = vec.at[5, :d_model].set(p["b2"])
        vec = vec.at[6, :d_model].set(p["gamma2"])
        vec = vec.at[7, :d_model].set(p["beta2"])
        vecs.append(vec)
    return dict(w_qkv=jnp.stack(w_qkv).astype(MXU_DTYPE),
                w_out=jnp.stack(w_out).astype(MXU_DTYPE),
                w1=jnp.stack(w1).astype(MXU_DTYPE),
                w2=jnp.stack(w2).astype(MXU_DTYPE),
                vecs=jnp.stack(vecs))


# ----------------------------- main -------------------------------------------


if __name__ == "__main__":
    B, S = 2, 8
    d_model, ffn_hidden, num_heads, drop_prob, num_layers = 32, 64, 4, 0.1, 2

    key = jax.random.PRNGKey(0)
    kx, kp = jax.random.split(key)
    x = jax.random.normal(kx, (B, S, d_model), dtype=jnp.float32)
    layer_params = init_encoder_params(kp, d_model, ffn_hidden, num_layers)

    # Reference Encoder passes `num_layers` into the num_heads slot of
    # EncoderLayer, so the effective head count is num_layers (reproduced).
    effective_heads = num_layers

    packed = pack_encoder_params(layer_params, effective_heads, d_model,
                                 ffn_hidden)

    y = encoder_forward(x, packed, num_heads=effective_heads)
    jax.block_until_ready(y)
    assert y.shape == (B, S, d_model) and y.dtype == jnp.float32
    print("KERNEL_OK")
</pallas_src>

<mosaic_0001>
module attributes {stable_mosaic.version = 11 : i64} {
  func.func @_encoder_kernel(%arg0: i32, %arg1: i32, %arg2: memref<8x32xf32, #tpu.memory_space<vmem>>, %arg3: memref<1x32x96xbf16, #tpu.memory_space<vmem>>, %arg4: memref<1x32x32xbf16, #tpu.memory_space<vmem>>, %arg5: memref<1x32x64xbf16, #tpu.memory_space<vmem>>, %arg6: memref<1x64x32xbf16, #tpu.memory_space<vmem>>, %arg7: memref<1x8x96xf32, #tpu.memory_space<vmem>>, %arg8: memref<8x32xf32, #tpu.memory_space<vmem>>, %arg9: memref<16x16xf32, #tpu.memory_space<vmem>>) attributes {dimension_semantics = [#tpu.dimension_semantics<parallel>, #tpu.dimension_semantics<arbitrary>], iteration_bounds = array<i64: 2, 2>, scalar_prefetch = 0 : i64, scratch_operands = 1 : i64, tpu.core_type = #tpu.core_type<tc>, window_params = [{transform_indices = @transform_0, window_bounds = array<i64: 8, 32>}, {transform_indices = @transform_1, window_bounds = array<i64: 1, 32, 96>}, {transform_indices = @transform_2, window_bounds = array<i64: 1, 32, 32>}, {transform_indices = @transform_3, window_bounds = array<i64: 1, 32, 64>}, {transform_indices = @transform_4, window_bounds = array<i64: 1, 64, 32>}, {transform_indices = @transform_5, window_bounds = array<i64: 1, 8, 96>}, {transform_indices = @transform_6, window_bounds = array<i64: 8, 32>}]} {
    %c0_i32 = arith.constant 0 : i32
    %0 = arith.cmpi eq, %arg1, %c0_i32 : i32
    %1 = arith.extui %0 : i1 to i32
    %c0_i32_0 = arith.constant 0 : i32
    %2 = arith.cmpi ne, %1, %c0_i32_0 : i32
    scf.if %2 {
      %c0_49 = arith.constant 0 : index
      %c0_50 = arith.constant 0 : index
      %133 = vector.load %arg2[%c0_49, %c0_50] : memref<8x32xf32, #tpu.memory_space<vmem>>, vector<8x32xf32>
      %c0_51 = arith.constant 0 : index
      %c0_52 = arith.constant 0 : index
      %134 = vector.load %arg8[%c0_51, %c0_52] : memref<8x32xf32, #tpu.memory_space<vmem>>, vector<8x32xf32>
      tpu.vector_store %arg8[%c0_51, %c0_52], %133 {strides = array<i32>} : memref<8x32xf32, #tpu.memory_space<vmem>>, vector<8x32xf32>,
    } else {
    }
    %c0 = arith.constant 0 : index
    %c0_1 = arith.constant 0 : index
    %3 = vector.load %arg8[%c0, %c0_1] : memref<8x32xf32, #tpu.memory_space<vmem>>, vector<8x32xf32>
    %c0_2 = arith.constant 0 : index
    %c0_3 = arith.constant 0 : index
    %c0_4 = arith.constant 0 : index
    %4 = vector.load %arg7[%c0_2, %c0_3, %c0_4] : memref<1x8x96xf32, #tpu.memory_space<vmem>>, vector<1x8x96xf32>
    %5 = vector.shape_cast %4 : vector<1x8x96xf32> to vector<8x96xf32>
    %6 = vector.extract_strided_slice %5 {offsets = [0, 0], sizes = [1, 96], strides = [1, 1]} : vector<8x96xf32> to vector<1x96xf32>
    %7 = vector.extract_strided_slice %5 {offsets = [1, 0], sizes = [1, 32], strides = [1, 1]} : vector<8x96xf32> to vector<1x32xf32>
    %8 = vector.extract_strided_slice %5 {offsets = [2, 0], sizes = [1, 32], strides = [1, 1]} : vector<8x96xf32> to vector<1x32xf32>
    %9 = vector.extract_strided_slice %5 {offsets = [3, 0], sizes = [1, 32], strides = [1, 1]} : vector<8x96xf32> to vector<1x32xf32>
    %10 = vector.extract_strided_slice %5 {offsets = [4, 0], sizes = [1, 64], strides = [1, 1]} : vector<8x96xf32> to vector<1x64xf32>
    %11 = vector.extract_strided_slice %5 {offsets = [5, 0], sizes = [1, 32], strides = [1, 1]} : vector<8x96xf32> to vector<1x32xf32>
    %12 = vector.extract_strided_slice %5 {offsets = [6, 0], sizes = [1, 32], strides = [1, 1]} : vector<8x96xf32> to vector<1x32xf32>
    %13 = vector.extract_strided_slice %5 {offsets = [7, 0], sizes = [1, 32], strides = [1, 1]} : vector<8x96xf32> to vector<1x32xf32>
    %c0_5 = arith.constant 0 : index
    %c0_6 = arith.constant 0 : index
    %c0_7 = arith.constant 0 : index
    %14 = vector.load %arg3[%c0_5, %c0_6, %c0_7] : memref<1x32x96xbf16, #tpu.memory_space<vmem>>, vector<1x32x96xbf16>
    %15 = vector.shape_cast %14 : vector<1x32x96xbf16> to vector<32x96xbf16>
    %16 = arith.truncf %3 : vector<8x32xf32> to vector<8x32xbf16>
    %cst = arith.constant dense<0.000000e+00> : vector<8x96xf32>
    %17 = tpu.matmul %16, %15, %cst {dimension_numbers = #tpu.dot_dimension_numbers<[1], [0], [0], [1], [0, 0, 1, 1], [], []>} : vector<8x32xbf16>, vector<32x96xbf16>, vector<8x96xf32> -> vector<8x96xf32>
    %18 = vector.broadcast %6 : vector<1x96xf32> to vector<8x96xf32>
    %19 = arith.addf %17, %18 : vector<8x96xf32>
    %20 = vector.extract_strided_slice %19 {offsets = [0, 0], sizes = [8, 32], strides = [1, 1]} : vector<8x96xf32> to vector<8x32xf32>
    %21 = vector.extract_strided_slice %19 {offsets = [0, 32], sizes = [8, 32], strides = [1, 1]} : vector<8x96xf32> to vector<8x32xf32>
    %22 = vector.extract_strided_slice %19 {offsets = [0, 64], sizes = [8, 32], strides = [1, 1]} : vector<8x96xf32> to vector<8x32xf32>
    %23 = vector.extract_strided_slice %20 {offsets = [0, 0], sizes = [8, 16], strides = [1, 1]} : vector<8x32xf32> to vector<8x16xf32>
    %24 = vector.extract_strided_slice %21 {offsets = [0, 0], sizes = [8, 16], strides = [1, 1]} : vector<8x32xf32> to vector<8x16xf32>
    %25 = vector.extract_strided_slice %22 {offsets = [0, 0], sizes = [8, 16], strides = [1, 1]} : vector<8x32xf32> to vector<8x16xf32>
    %26 = arith.truncf %23 : vector<8x16xf32> to vector<8x16xbf16>
    %27 = arith.truncf %24 : vector<8x16xf32> to vector<8x16xbf16>
    %cst_8 = arith.constant dense<0.000000e+00> : vector<8x8xf32>
    %28 = tpu.matmul %26, %27, %cst_8 {dimension_numbers = #tpu.dot_dimension_numbers<[1], [1], [0], [0], [0, 0, 1, 0], [], []>} : vector<8x16xbf16>, vector<8x16xbf16>, vector<8x8xf32> -> vector<8x8xf32>
    %cst_9 = arith.constant 2.500000e-01 : f32
    %29 = vector.broadcast %cst_9 : f32 to vector<8x8xf32>
    %30 = arith.mulf %28, %29 : vector<8x8xf32>
    %cst_10 = arith.constant dense<0xFF800000> : vector<8xf32>
    %31 = vector.multi_reduction <maximumf>, %30, %cst_10 [1] : vector<8x8xf32> to vector<8xf32>
    %32 = vector.shape_cast %31 : vector<8xf32> to vector<8x1xf32>
    %33 = vector.broadcast %32 : vector<8x1xf32> to vector<8x8xf32>
    %34 = arith.subf %30, %33 : vector<8x8xf32>
    %35 = math.exp %34 : vector<8x8xf32>
    %cst_11 = arith.constant dense<0.000000e+00> : vector<8xf32>
    %36 = vector.multi_reduction <add>, %35, %cst_11 [1] : vector<8x8xf32> to vector<8xf32>
    %37 = vector.shape_cast %36 : vector<8xf32> to vector<8x1xf32>
    %38 = tpu.reciprocal %37 {approx = true} : vector<8x1xf32> -> vector<8x1xf32>
    %39 = vector.broadcast %38 : vector<8x1xf32> to vector<8x8xf32>
    %40 = arith.mulf %35, %39 : vector<8x8xf32>
    %41 = arith.truncf %40 : vector<8x8xf32> to vector<8x8xbf16>
    %42 = arith.truncf %25 : vector<8x16xf32> to vector<8x16xbf16>
    %cst_12 = arith.constant dense<0.000000e+00> : vector<8x16xf32>
    %43 = tpu.matmul %41, %42, %cst_12 {dimension_numbers = #tpu.dot_dimension_numbers<[1], [0], [0], [1], [0, 0, 1, 1], [], []>} : vector<8x8xbf16>, vector<8x16xbf16>, vector<8x16xf32> -> vector<8x16xf32>
    %c0_13 = arith.constant 0 : index
    %c0_14 = arith.constant 0 : index
    %44 = vector.load %arg9[%c0_13, %c0_14] : memref<16x16xf32, #tpu.memory_space<vmem>>, vector<8x16xf32>
    tpu.vector_store %arg9[%c0_13, %c0_14], %43 {strides = array<i32>} : memref<16x16xf32, #tpu.memory_space<vmem>>, vector<8x16xf32>,
    %45 = vector.extract_strided_slice %20 {offsets = [0, 16], sizes = [8, 16], strides = [1, 1]} : vector<8x32xf32> to vector<8x16xf32>
    %46 = vector.extract_strided_slice %21 {offsets = [0, 16], sizes = [8, 16], strides = [1, 1]} : vector<8x32xf32> to vector<8x16xf32>
    %47 = vector.extract_strided_slice %22 {offsets = [0, 16], sizes = [8, 16], strides = [1, 1]} : vector<8x32xf32> to vector<8x16xf32>
    %48 = arith.truncf %45 : vector<8x16xf32> to vector<8x16xbf16>
    %49 = arith.truncf %46 : vector<8x16xf32> to vector<8x16xbf16>
    %cst_15 = arith.constant dense<0.000000e+00> : vector<8x8xf32>
    %50 = tpu.matmul %48, %49, %cst_15 {dimension_numbers = #tpu.dot_dimension_numbers<[1], [1], [0], [0], [0, 0, 1, 0], [], []>} : vector<8x16xbf16>, vector<8x16xbf16>, vector<8x8xf32> -> vector<8x8xf32>
    %cst_16 = arith.constant 2.500000e-01 : f32
    %51 = vector.broadcast %cst_16 : f32 to vector<8x8xf32>
    %52 = arith.mulf %50, %51 : vector<8x8xf32>
    %cst_17 = arith.constant dense<0xFF800000> : vector<8xf32>
    %53 = vector.multi_reduction <maximumf>, %52, %cst_17 [1] : vector<8x8xf32> to vector<8xf32>
    %54 = vector.shape_cast %53 : vector<8xf32> to vector<8x1xf32>
    %55 = vector.broadcast %54 : vector<8x1xf32> to vector<8x8xf32>
    %56 = arith.subf %52, %55 : vector<8x8xf32>
    %57 = math.exp %56 : vector<8x8xf32>
    %cst_18 = arith.constant dense<0.000000e+00> : vector<8xf32>
    %58 = vector.multi_reduction <add>, %57, %cst_18 [1] : vector<8x8xf32> to vector<8xf32>
    %59 = vector.shape_cast %58 : vector<8xf32> to vector<8x1xf32>
    %60 = tpu.reciprocal %59 {approx = true} : vector<8x1xf32> -> vector<8x1xf32>
    %61 = vector.broadcast %60 : vector<8x1xf32> to vector<8x8xf32>
    %62 = arith.mulf %57, %61 : vector<8x8xf32>
    %63 = arith.truncf %62 : vector<8x8xf32> to vector<8x8xbf16>
    %64 = arith.truncf %47 : vector<8x16xf32> to vector<8x16xbf16>
    %cst_19 = arith.constant dense<0.000000e+00> : vector<8x16xf32>
    %65 = tpu.matmul %63, %64, %cst_19 {dimension_numbers = #tpu.dot_dimension_numbers<[1], [0], [0], [1], [0, 0, 1, 1], [], []>} : vector<8x8xbf16>, vector<8x16xbf16>, vector<8x16xf32> -> vector<8x16xf32>
    %c8 = arith.constant 8 : index
    %c0_20 = arith.constant 0 : index
    %66 = vector.load %arg9[%c8, %c0_20] : memref<16x16xf32, #tpu.memory_space<vmem>>, vector<8x16xf32>
    tpu.vector_store %arg9[%c8, %c0_20], %65 {strides = array<i32>} : memref<16x16xf32, #tpu.memory_space<vmem>>, vector<8x16xf32>,
    %c0_21 = arith.constant 0 : index
    %c0_22 = arith.constant 0 : index
    %67 = tpu.strided_load %arg9[%c0_21, %c0_22] {strides = array<i32: 2, 1>} : memref<16x16xf32, #tpu.memory_space<vmem>>, vector<8x16xf32>
    %c1 = arith.constant 1 : index
    %c0_23 = arith.constant 0 : index
    %68 = tpu.strided_load %arg9[%c1, %c0_23] {strides = array<i32: 2, 1>} : memref<16x16xf32, #tpu.memory_space<vmem>>, vector<8x16xf32>
    %69 = tpu.concatenate %67, %68 in 1 : vector<8x16xf32>, vector<8x16xf32> -> vector<8x32xf32>
    %c0_24 = arith.constant 0 : index
    %c0_25 = arith.constant 0 : index
    %c0_26 = arith.constant 0 : index
    %70 = vector.load %arg4[%c0_24, %c0_25, %c0_26] : memref<1x32x32xbf16, #tpu.memory_space<vmem>>, vector<1x32x32xbf16>
    %71 = vector.shape_cast %70 : vector<1x32x32xbf16> to vector<32x32xbf16>
    %72 = arith.truncf %69 : vector<8x32xf32> to vector<8x32xbf16>
    %cst_27 = arith.constant dense<0.000000e+00> : vector<8x32xf32>
    %73 = tpu.matmul %72, %71, %cst_27 {dimension_numbers = #tpu.dot_dimension_numbers<[1], [0], [0], [1], [0, 0, 1, 1], [], []>} : vector<8x32xbf16>, vector<32x32xbf16>, vector<8x32xf32> -> vector<8x32xf32>
    %74 = vector.broadcast %7 : vector<1x32xf32> to vector<8x32xf32>
    %75 = arith.addf %73, %74 : vector<8x32xf32>
    %76 = arith.addf %75, %3 : vector<8x32xf32>
    %cst_28 = arith.constant dense<0.000000e+00> : vector<8xf32>
    %77 = vector.multi_reduction <add>, %76, %cst_28 [1] : vector<8x32xf32> to vector<8xf32>
    %78 = vector.shape_cast %77 : vector<8xf32> to vector<8x1xf32>
    %cst_29 = arith.constant 3.200000e+01 : f32
    %79 = vector.broadcast %cst_29 : f32 to vector<8x1xf32>
    %80 = arith.divf %78, %79 : vector<8x1xf32>
    %81 = vector.broadcast %80 : vector<8x1xf32> to vector<8x32xf32>
    %82 = arith.subf %76, %81 : vector<8x32xf32>
    %83 = arith.mulf %82, %82 : vector<8x32xf32>
    %cst_30 = arith.constant dense<0.000000e+00> : vector<8xf32>
    %84 = vector.multi_reduction <add>, %83, %cst_30 [1] : vector<8x32xf32> to vector<8xf32>
    %85 = vector.shape_cast %84 : vector<8xf32> to vector<8x1xf32>
    %cst_31 = arith.constant 3.200000e+01 : f32
    %86 = vector.broadcast %cst_31 : f32 to vector<8x1xf32>
    %87 = arith.divf %85, %86 : vector<8x1xf32>
    %cst_32 = arith.constant 9.99999974E-6 : f32
    %88 = vector.broadcast %cst_32 : f32 to vector<8x1xf32>
    %89 = arith.addf %87, %88 : vector<8x1xf32>
    %90 = math.rsqrt %89 : vector<8x1xf32>
    %91 = vector.broadcast %90 : vector<8x1xf32> to vector<8x32xf32>
    %92 = arith.mulf %82, %91 : vector<8x32xf32>
    %93 = vector.broadcast %8 : vector<1x32xf32> to vector<8x32xf32>
    %94 = arith.mulf %93, %92 : vector<8x32xf32>
    %95 = vector.broadcast %9 : vector<1x32xf32> to vector<8x32xf32>
    %96 = arith.addf %94, %95 : vector<8x32xf32>
    %c0_33 = arith.constant 0 : index
    %c0_34 = arith.constant 0 : index
    %c0_35 = arith.constant 0 : index
    %97 = vector.load %arg5[%c0_33, %c0_34, %c0_35] : memref<1x32x64xbf16, #tpu.memory_space<vmem>>, vector<1x32x64xbf16>
    %98 = vector.shape_cast %97 : vector<1x32x64xbf16> to vector<32x64xbf16>
    %99 = arith.truncf %96 : vector<8x32xf32> to vector<8x32xbf16>
    %cst_36 = arith.constant dense<0.000000e+00> : vector<8x64xf32>
    %100 = tpu.matmul %99, %98, %cst_36 {dimension_numbers = #tpu.dot_dimension_numbers<[1], [0], [0], [1], [0, 0, 1, 1], [], []>} : vector<8x32xbf16>, vector<32x64xbf16>, vector<8x64xf32> -> vector<8x64xf32>
    %101 = vector.broadcast %10 : vector<1x64xf32> to vector<8x64xf32>
    %102 = arith.addf %100, %101 : vector<8x64xf32>
    %cst_37 = arith.constant 0.000000e+00 : f32
    %103 = vector.broadcast %cst_37 : f32 to vector<8x64xf32>
    %104 = arith.maximumf %102, %103 : vector<8x64xf32>
    %c0_38 = arith.constant 0 : index
    %c0_39 = arith.constant 0 : index
    %c0_40 = arith.constant 0 : index
    %105 = vector.load %arg6[%c0_38, %c0_39, %c0_40] : memref<1x64x32xbf16, #tpu.memory_space<vmem>>, vector<1x64x32xbf16>
    %106 = vector.shape_cast %105 : vector<1x64x32xbf16> to vector<64x32xbf16>
    %107 = arith.truncf %104 : vector<8x64xf32> to vector<8x64xbf16>
    %cst_41 = arith.constant dense<0.000000e+00> : vector<8x32xf32>
    %108 = tpu.matmul %107, %106, %cst_41 {dimension_numbers = #tpu.dot_dimension_numbers<[1], [0], [0], [1], [0, 0, 1, 1], [], []>} : vector<8x64xbf16>, vector<64x32xbf16>, vector<8x32xf32> -> vector<8x32xf32>
    %109 = vector.broadcast %11 : vector<1x32xf32> to vector<8x32xf32>
    %110 = arith.addf %108, %109 : vector<8x32xf32>
    %111 = arith.addf %110, %96 : vector<8x32xf32>
    %cst_42 = arith.constant dense<0.000000e+00> : vector<8xf32>
    %112 = vector.multi_reduction <add>, %111, %cst_42 [1] : vector<8x32xf32> to vector<8xf32>
    %113 = vector.shape_cast %112 : vector<8xf32> to vector<8x1xf32>
    %cst_43 = arith.constant 3.200000e+01 : f32
    %114 = vector.broadcast %cst_43 : f32 to vector<8x1xf32>
    %115 = arith.divf %113, %114 : vector<8x1xf32>
    %116 = vector.broadcast %115 : vector<8x1xf32> to vector<8x32xf32>
    %117 = arith.subf %111, %116 : vector<8x32xf32>
    %118 = arith.mulf %117, %117 : vector<8x32xf32>
    %cst_44 = arith.constant dense<0.000000e+00> : vector<8xf32>
    %119 = vector.multi_reduction <add>, %118, %cst_44 [1] : vector<8x32xf32> to vector<8xf32>
    %120 = vector.shape_cast %119 : vector<8xf32> to vector<8x1xf32>
    %cst_45 = arith.constant 3.200000e+01 : f32
    %121 = vector.broadcast %cst_45 : f32 to vector<8x1xf32>
    %122 = arith.divf %120, %121 : vector<8x1xf32>
    %cst_46 = arith.constant 9.99999974E-6 : f32
    %123 = vector.broadcast %cst_46 : f32 to vector<8x1xf32>
    %124 = arith.addf %122, %123 : vector<8x1xf32>
    %125 = math.rsqrt %124 : vector<8x1xf32>
    %126 = vector.broadcast %125 : vector<8x1xf32> to vector<8x32xf32>
    %127 = arith.mulf %117, %126 : vector<8x32xf32>
    %128 = vector.broadcast %12 : vector<1x32xf32> to vector<8x32xf32>
    %129 = arith.mulf %128, %127 : vector<8x32xf32>
    %130 = vector.broadcast %13 : vector<1x32xf32> to vector<8x32xf32>
    %131 = arith.addf %129, %130 : vector<8x32xf32>
    %c0_47 = arith.constant 0 : index
    %c0_48 = arith.constant 0 : index
    %132 = vector.load %arg8[%c0_47, %c0_48] : memref<8x32xf32, #tpu.memory_space<vmem>>, vector<8x32xf32>
    tpu.vector_store %arg8[%c0_47, %c0_48], %131 {strides = array<i32>} : memref<8x32xf32, #tpu.memory_space<vmem>>, vector<8x32xf32>,
    return
  }
  func.func @transform_0(%arg0: i32, %arg1: i32) -> (i32, i32) {
    %c0_i32 = arith.constant 0 : i32
    %c0_i32_0 = arith.constant 0 : i32
    return %arg0, %c0_i32 : i32, i32
  }
  func.func @transform_1(%arg0: i32, %arg1: i32) -> (i32, i32, i32) {
    %c0_i32 = arith.constant 0 : i32
    %c0_i32_0 = arith.constant 0 : i32
    %c0_i32_1 = arith.constant 0 : i32
    return %arg1, %c0_i32, %c0_i32_0 : i32, i32, i32
  }
  func.func @transform_2(%arg0: i32, %arg1: i32) -> (i32, i32, i32) {
    %c0_i32 = arith.constant 0 : i32
    %c0_i32_0 = arith.constant 0 : i32
    %c0_i32_1 = arith.constant 0 : i32
    return %arg1, %c0_i32, %c0_i32_0 : i32, i32, i32
  }
  func.func @transform_3(%arg0: i32, %arg1: i32) -> (i32, i32, i32) {
    %c0_i32 = arith.constant 0 : i32
    %c0_i32_0 = arith.constant 0 : i32
    %c0_i32_1 = arith.constant 0 : i32
    return %arg1, %c0_i32, %c0_i32_0 : i32, i32, i32
  }
  func.func @transform_4(%arg0: i32, %arg1: i32) -> (i32, i32, i32) {
    %c0_i32 = arith.constant 0 : i32
    %c0_i32_0 = arith.constant 0 : i32
    %c0_i32_1 = arith.constant 0 : i32
    return %arg1, %c0_i32, %c0_i32_0 : i32, i32, i32
  }
  func.func @transform_5(%arg0: i32, %arg1: i32) -> (i32, i32, i32) {
    %c0_i32 = arith.constant 0 : i32
    %c0_i32_0 = arith.constant 0 : i32
    %c0_i32_1 = arith.constant 0 : i32
    return %arg1, %c0_i32, %c0_i32_0 : i32, i32, i32
  }
  func.func @transform_6(%arg0: i32, %arg1: i32) -> (i32, i32) {
    %c0_i32 = arith.constant 0 : i32
    %c0_i32_0 = arith.constant 0 : i32
    return %arg0, %c0_i32 : i32, i32
  }
}

</mosaic_0001>

<bundles_post_ra>
// kernel: tpu_custom_call.1
= control target key start
LH: loop header
LB: loop body
LE: loop exit
PB: predicated region body
PF: predicated region fallthrough
CT: control target
= control target key end

     0   :  { %s1656_s0 = inlined_call_operand.hbm [shape: f32[16,32], index: 0, kind: input, shape index: {}, may-alias: {0,6}]   ;;  %s1657_s1 = inlined_call_operand.vmem [shape: bf16[2,32,96], index: 1, kind: input, shape index: {}]   ;;  %s1658_s2 = inlined_call_operand.vmem [shape: bf16[2,32,32], index: 2, kind: input, shape index: {}]   ;;  %s1659_s3 = inlined_call_operand.vmem [shape: bf16[2,32,64], index: 3, kind: input, shape index: {}]   ;;  %s1660_s4 = inlined_call_operand.vmem [shape: bf16[2,64,32], index: 4, kind: input, shape index: {}]   ;;  %s1661_s5 = inlined_call_operand.hbm [shape: f32[2,8,96], index: 5, kind: input, shape index: {}]   ;;  %s1662_s6 = inlined_call_operand.hbm [shape: f32[16,32], index: 6, kind: output, shape index: {}, may-alias: {0,6}]  }
   0x1   :  { %1672 = sst [smem:[#allocation20_spill]] %s1656_s0 }
   0x2   :  { %1673 = sst [smem:[#allocation21_spill]] %s1660_s4 }
   0x3   :  { %1674 = sst [smem:[#allocation22_spill]] %s1661_s5 }
   0x4   :  { %1675 = sst [smem:[#allocation23_spill]] %s1662_s6 }
   0x5   :  { %11 = vsyncpa [#allocation4], 0 }
   0x6   :  { %13 = vsyncpa [#allocation4 + $0x1], 0 }
   0x7   :  { %14 = vsyncpa [#allocation7], 0 }
   0x8   :  { %16 = vsyncpa [#allocation7 + $0x1], 0 }
   0x9   :  { %17 = vsyncpa [#allocation5], 0 }
   0xa   :  { %19 = vsyncpa [#allocation5 + $0x1], 0  ;;  %s1367_s21 = smov 0   ;;  %s1369_s22 = smov 0  }
   0xb   :  { %s1371_s23 = smov 0   ;;  %s1373_s24 = smov 0  }
   0xc   :  { %s1375_s25 = smov 0   ;;  %s1377_s26 = smov 0  }
   0xd   :  { %s1379_s27 = smov 0   ;;  %s1381_s28 = smov 0  }
   0xe   :  { %s1383_s29 = smov 0   ;;  %s1385_s30 = smov 0  }
   0xf   :  { %s1387_s7 = smov 0  }
  0x10 LB: > { %1676 = sst [smem:[#allocation12_spill]] %s1295_s24  ;;  %s922_s8 = sadd.s32 4294967295, %s1323_s7   ;;  %s1323_s7 = sphi %s1387_s7, %s25_s7   ;;  %s1319_s30 = sphi %s1385_s30, %s1705_s30   ;;  %s1315_s29 = sphi %s1383_s29, %s1704_s29   ;;  %s1311_s28 = sphi %s1381_s28, %s1703_s28   ;;  %s1307_s27 = sphi %s1379_s27, %s1702_s27   ;;  %s1303_s26 = sphi %s1377_s26, %s1711_s26   ;;  %s1299_s25 = sphi %s1375_s25, %s1710_s25   ;;  %s1295_s24 = sphi %s1373_s24, %s1709_s24   ;;  %s1291_s23 = sphi %s1371_s23, %s1708_s23   ;;  %s1287_s22 = sphi %s1369_s22, %s1707_s22   ;;  %s1283_s21 = sphi %s1367_s21, %s1706_s21  }
  0x11   : > { %1677 = sst [smem:[#allocation13_spill]] %s1311_s28  ;;  %s923_s9 = sadd.s32 4294967294, %s1323_s7  }
  0x12   : > { %1678 = sst [smem:[#allocation14_spill]] %s1315_s29  ;;  %p51_p0 = scmp.ne.s32.totalorder %s1303_s26, %s1299_s25 }
  0x13   : > { %1679 = sst [smem:[#allocation15_spill]] %s1319_s30  ;;  %p52_p1 = scmp.eq.s32.totalorder %s1323_s7, 0 }
  0x14   : > { %p57_p2 = scmp.ne.s32.totalorder %s1299_s25, %s1295_s24  ;;  %p1431_p3 = scmp.eq.s32.totalorder %s922_s8, 0 }
  0x15   : > { %p1437_p4 = por %p52_p1, %p51_p0  ;;  %p211_p5 = scmp.eq.s32.totalorder %s922_s8, 3 }
  0x16   : > { %p1443_p6 = por %p1431_p3, %p57_p2  ;;  %p217_p7 = scmp.eq.s32.totalorder %s923_s9, 3 }
  0x17   : > { %p1447_p8 = por %p211_p5, %p51_p0  ;;  %p1026_p10 = scmp.lt.s32.totalorder %s1323_s7, 4 }
  0x18   : > { %p1451_p9 = por %p217_p7, %p57_p2  ;;  %s237_s17 = sand.u32 1, %s1303_s26  }
  0x19   : > { %s1683_s15 = scalar_select %p1447_p8, 1, 0 }
  0x1a   : > { %s1685_s16 = scalar_select %p1451_p9, 1, 0 }
  0x1b   : > { %1684 = sst [smem:[#allocation16_spill]] %s1683_s15  ;;  %s927_s18 = sshll.u32 %s1319_s30, 3 }
  0x1c   : > { %1686 = sst [smem:[#allocation17_spill]] %s1685_s16  ;;  %s926_s19 = sshll.u32 %s237_s17, 3 }
  0x1d   : > { %s1687_s0 = sld [smem:[#allocation20_spill]]  ;;  %s241_s10 = scalar_lea.vmem [#allocation3], %s926_s19 }
  0x1e   : > { %s249_s24 = sshll.u32 %s241_s10, 4  ;;  %p1016_p11 = pnand %p1026_p10, %p1437_p4  ;;  %s250_s24 = int_to_ptr.vmem [resolvable:$true] %s249_s24 }
  0x1f   : > { %p930_p12 = scmp.ge.s32.totalorder %s1323_s7, 1  ;;  %p305_p13 = scmp.lt.s32.totalorder %s1323_s7, 5 }
  0x20   : > { %s238_s20 = scalar_lea.sflag [#allocation4], %s237_s17  ;;  %s34_s10 = sadd.s32 1, %s1315_s29 }
  0x21   : > { %p1467_p0 = pnand %p930_p12, %p305_p13  ;;  %p35_p2 = scmp.ge.s32.totalorder %s34_s10, 2 }
  0x22   : > { %s174_s19 = sadd.s32 1, %s1291_s23  ;;  %p181_p5 = scmp.ne.s32.totalorder %s1291_s23, %s1287_s22 }
  0x23   : > { %s245_s9 = scalar_lea.hbm %s1687_s0, %s927_s18  ;;  %p187_p4 = scmp.ne.s32.totalorder %s1287_s22, %s1283_s21 }
  0x24   : > { %s247_s11 = sshll.u32 %s245_s9, 4  ;;  %s1713_s10 = smov (%p35_p2, %s34_s10), 0  ;;  %s248_s11 = int_to_ptr.hbm [resolvable:$true] %s247_s11 }
  0x25   : > { %1018 = dma.hbm_to_vmem [thread:$0]  (!%p1016_p11), %s248_s11, 128, %s250_s24, %s238_s20  }
  0x26   : > { %1689 = sst [smem:[#allocation18_spill]] %s1713_s10  ;;  %s1690_s13 = sadd.s32 1, %s1319_s30 }
  0x27   : > { %s1715_s13 = smov (!%p35_p2, %s1690_s13), %s1319_s30  ;;  %s171_s24 = ssub.s32 %s1315_s29, %s1713_s10 }
  0x28   : > { %p1486_p7 = por %p181_p5, %p52_p1  ;;  %p39_p11 = scmp.ge.s32.totalorder %s1715_s13, 2 }
  0x29   : > { %p172_p12 = scmp.eq.s32.totalorder %s171_s24, 0  ;;  %p1492_p13 = por %p187_p4, %p1431_p3 }
  0x2a   : > { %s288_s21 = sand.u32 1, %s1291_s23   ;;  %s1717_s13 = smov (%p39_p11, %s1715_s13), 0 }
  0x2b   : > { %1693 = sst [smem:[#allocation19_spill]] %s1717_s13  ;;  %s41_s9 = ssub.s32 %s1319_s30, %s1717_s13 }
  0x2c   : > { %s1500_s8 = scalar_select %p172_p12, %s1291_s23, %s174_s19  }
  0x2d   : > { %p42_p1 = scmp.eq.s32.totalorder %s41_s9, 0  ;;  %s928_s20 = sshll.u32 %s288_s21, 3 }
  0x2e   : > { %s929_s0 = sshll.u32 %s1315_s29, 3  ;;  %s1694_s10 = sadd.s32 1, %s1303_s26 }
  0x2f   : > { %s1508_s16 = scalar_select %p42_p1, %s1303_s26, %s1694_s10  }
  0x30   : > { %s1695_s5 = sld [smem:[#allocation22_spill]]  ;;  %s292_s6 = scalar_lea.vmem [#allocation6], %s928_s20 }
  0x31   : > { %s300_s28 = sshll.u32 %s292_s6, 4  ;;  %p1019_p3 = pnand %p1026_p10, %p1486_p7  ;;  %s301_s28 = int_to_ptr.vmem [resolvable:$true] %s300_s28 }
  0x32   : > { %s289_s19 = scalar_lea.sflag [#allocation7], %s288_s21  ;;  %s1520_s10 = sand.u32 (!%p1467_p0), 1, %s1299_s25  }
  0x33   : > { %s312_s9 = scalar_lea.sflag (!%p1467_p0), [#allocation4], %s1520_s10 }
  0x34   : > { %309 = sbr.rel (%p1467_p0) target bundleno = 1907 (0x773), region = 44 }
  0x36   : > { %s296_s15 = scalar_lea.hbm %s1695_s5, %s929_s0  ;;  %s931_s0 = sshll.u32 (!%p1467_p0), %s1520_s10, 3 }
  0x37   : > { %s298_s4 = sshll.u32 %s296_s15, 4  ;;  %s315_s6 = scalar_lea.vmem (!%p1467_p0), [#allocation3], %s931_s0  ;;  %s299_s4 = int_to_ptr.hbm [resolvable:$true] %s298_s4 }
  0x38   : > { %1021 = dma.hbm_to_vmem [thread:$0]  (!%p1019_p3), %s299_s4, 128, %s301_s28, %s289_s19  }
  0x39   : > { %1270 = dma.done.wait (%p1443_p6), %s312_s9, 128  }
  0x3a   : > { %1272 = vsyncadd (%p1443_p6), %s312_s9, 4294967168  ;;  %s321_s4 = sand.u32 1, %s1287_s22  }
  0x3b   : > { %s932_s28 = sshll.u32 %s321_s4, 3  ;;  %s322_s15 = scalar_lea.sflag [#allocation7], %s321_s4 }
  0x3c   : > { %s325_s18 = scalar_lea.vmem [#allocation6], %s932_s28 }
  0x3d   : > { %1274 = dma.done.wait (%p1492_p13), %s322_s15, 128  }
  0x3e   : > { %1276 = vsyncadd (%p1492_p13), %s322_s15, 4294967168  ;;  %p380_p10 = scmp.lt.s32.totalorder %s1307_s27, 1  ;;  %s1696_s30 = sld [smem:[#allocation21_spill]] }
  0x3f   : > { %p942_p6 = scmp.ne.s32.totalorder %s1307_s27, 0 }
  0x40   : > { %s381_s11 = scalar_select %p380_p10, %s1307_s27, 1 }
  0x41   : > { %404 = sbr.rel (%p942_p6) target bundleno = 72 (0x48), region = 56 }
  0x42   : > { %s995_s21 = sshll.u32 %s381_s11, 4  ;;  %s998_s20 = sshll.u32 %s381_s11, 5 }
  0x43   : > { %s384_s24 = scalar_lea.vmem %s1657_s1, %s995_s21  ;;  %s1541_s4 = scalar_lea.vmem %s1658_s2, %s995_s21 }
  0x44   : > { %s1546_s17 = scalar_lea.vmem %s1659_s3, %s995_s21  ;;  %s1551_s29 = scalar_lea.vmem %s1696_s30, %s998_s20 }
  0x45   : > { %s1553_s11 = scalar_lea.vmem [#allocation8], %s931_s0 }
  0x46   : > { %v405_v0 = vld [vmem:[%s315_s6] sm:$0xff]  ;;  %vm406_vm0 = vcmask 261120  }
  0x47   : > { %407 = vst.msk [vmem:[%s1553_s11] sm:$0xff] %vm406_vm0, %v405_v0 }
  0x48 PF: > { %v1000_v1 = vld [vmem:[%s384_s24 + $0x8] sm:$0xff]  ;;  %v999_v2 = vld [vmem:[%s384_s24] sm:$0xff]  ;;  %vm428_vm1 = vcmask 261120   ;;  %s1325_s5 = smov 112   ;;  %s1326_s27 = smov 96   ;;  %vm449_vm2 = vcmask 130048  }
  0x49   : > { %438 = vmatpush.bf16.msra.mxu0 %v1000_v1  ;;  %v1563_v5 = vld [vmem:[%s325_s18] sm:$0xff]  ;;  %s1327_s30 = smov 80   ;;  %s1328_s13 = smov 64   ;;  %vm488_vm3 = vcmask 1043456   ;;  %vm470_vm4 = vcmask 64512   ;;  %v1331_v63 = vmov 32.0  }
  0x4a   : > { %v415_v6 = vperm.slane %v1563_v5, 0  ;;  %s1329_s0 = smov 48   ;;  %v1002_v46 = vld [vmem:[%s1541_s4 + $0x8] sm:$0xff]  ;;  %v1001_v47 = vld [vmem:[%s1541_s4] sm:$0xff]  ;;  %s1330_s6 = smov 16   ;;  %v577_v57 = vperm.slane %v1563_v5, 1 }
  0x4b   : > { %vm709_vm9 = vcmask 523264   ;;  %s1698_s12 = sld [smem:[#allocation23_spill]]  ;;  %s767_s19 = sshll.u32 %s1553_s11, 4  ;;  %s768_s19 = int_to_ptr.vmem [resolvable:$true] %s767_s19 }
  0x4c   : > { %s755_s4 = scalar_lea.sflag [#allocation5], %s1520_s10 }
  0x4d   : > { %439 = vmatpush.bf16.msra.mxu0 %v999_v2 }
  0x4e   : > { %v1558_v3 = vld [vmem:[%s1553_s11] sm:$0xff] }
  0x4f   : > { %v414_v4 = vpack.c.bf16 %v1558_v3, %v1558_v3 }
  0x51   : > { %951 = vmatmul.msk.bf16.vlgmr.msra.gmra.mxu0 %vm428_vm1, %v414_v4 }
  0x52   : > { %599 = vmatpush.bf16.msrb.mxu0 %v1002_v46 }
  0x56   : > { %600 = vmatpush.bf16.msrb.mxu0 %v1001_v47 }
  0xce   : > { %v441_v7 = vpop.f32.mrf.mxu0 }
  0xcf   : > { %v442_v8 = vadd.f32 %v441_v7, %v415_v6 }
  0xd1   : > { %v445_v9 = vpack.c.bf16 %v442_v8, %v442_v8 }
  0xd3   : > { %506 = vrot.lane.b32.xlu1 %v445_v9, %s1325_s5  ;;  %447 = vrot.lane.b32.xlu0 %v445_v9, %s1326_s27  ;;  %s1217_s27 = scalar_lea.hbm %s1698_s12, 16 }
  0xd6   : > { %v443_v10 = vpop.f32.mrf.mxu0 }
  0xdb   : > { %508 = vrot.lane.b32.xlu0 %v445_v9, %s1327_s30 }
  0xe3   : > { %483 = vrot.lane.b32.xlu0 %v445_v9, %s1328_s13 }
  0xeb   : > { %542 = vrot.lane.b32.xlu0 %v445_v9, %s1329_s0 }
 0x145   : > { %v448_v11 = vpop.permute.xlu0 %447  ;;  %v507_v15 = vpop.permute.xlu1 %506 }
 0x146   : > { %v454_v12 = vsel %vm449_vm2, %v448_v11, 0 }
 0x147   : > { %463 = vmatpush.bf16.xpose.msra.mxu1 %v454_v12  ;;  %v1004_v12 = vld [vmem:[%s1546_s17 + $0x8] sm:$0xff] }
 0x14d   : > { %v509_v13 = vpop.permute.xlu0 %508 }
 0x14e   : > { %952 = vmatmul.msk.bf16.vlgmr.msra.gmra.mxu1 %vm449_vm2, %v445_v9  ;;  %v514_v14 = vsel %vm449_vm2, %v509_v13, 0  ;;  %v1003_v13 = vld [vmem:[%s1546_s17] sm:$0xff] }
 0x14f   : > { %523 = vmatpush.bf16.xpose.msra.mxu3 %v514_v14  ;;  %667 = vmatpush.bf16.msrb.mxu1 %v1004_v12  ;;  %v1008_v14 = vld [vmem:[%s1551_s29 + $0x18] sm:$0xff] }
 0x153   : > { %668 = vmatpush.bf16.msrb.mxu1 %v1003_v13 }
 0x155   : > { %v484_v16 = vpop.permute.xlu0 %483 }
 0x156   : > { %954 = vmatmul.msk.bf16.vlgmr.msra.gmra.mxu3 %vm449_vm2, %v507_v15  ;;  %v490_v17 = vsel %vm488_vm3, %v484_v16, 0 }
 0x157   : > { %499 = vmatpush.bf16.msra.mxu2 %v490_v17  ;;  %717 = vmatpush.bf16.msrb.mxu3 %v1008_v14  ;;  %v1007_v17 = vld [vmem:[%s1551_s29 + $0x10] sm:$0xff] }
 0x15b   : > { %718 = vmatpush.bf16.msrb.mxu3 %v1007_v17 }
 0x15d   : > { %v543_v18 = vpop.permute.xlu0 %542 }
 0x15e   : > { %v548_v19 = vsel %vm488_vm3, %v543_v18, 0 }
 0x15f   : > { %557 = vmatpush.bf16.msrb.mxu2 %v548_v19  ;;  %v1006_v19 = vld [vmem:[%s1551_s29 + $0x8] sm:$0xff] }
 0x160   : > { %719 = vmatpush.bf16.msrb.mxu3 %v1006_v19 }
 0x1cb   : > { %v465_v20 = vpop.f32.mrf.mxu1 }
 0x1cc   : > { %v469_v21 = vmul.f32 0.25, %v465_v20 }
 0x1ce   : > { %v471_v22 = vsel %vm470_vm4, %v469_v21, -inf }
 0x1cf   : > { %472 = vmax.xlane.f32.xlu1 %v471_v22 }
 0x1d3   : > { %v467_v23 = vpop.f32.mrf.mxu1 }
 0x1d9   : > { %v525_v24 = vpop.f32.mrf.mxu3 }
 0x1da   : > { %v529_v25 = vmul.f32 0.25, %v525_v24 }
 0x1dc   : > { %v530_v26 = vsel %vm470_vm4, %v529_v25, -inf }
 0x1dd   : > { %531 = vmax.xlane.f32.xlu2 %v530_v26  ;;  %v636_v26 = vperm.slane %v1563_v5, 2 }
 0x1e1   : > { %v527_v27 = vpop.f32.mrf.mxu3 }
 0x242   : > { %v473_v28 = vpop.xlane.xlu1 %472 }
 0x243   : > { %v474_v29 = vsub.f32 %v469_v21, %v473_v28 }
 0x245   : > { %v475_v30 = vmul.f32 1.442695, %v474_v29  ;;  %v638_v29 = vperm.slane %v1563_v5, 3 }
 0x247   : > { %1123 = vpow2.f32 %v475_v30 }
 0x24d   : > { %v1124_v31 = vpop.eup %1123 }
 0x24e   : > { %v477_v32 = vsel %vm470_vm4, %v1124_v31, 0.0 }
 0x24f   : > { %478 = vadd.xlane.f32.xlu2 %v477_v32 }
 0x250   : > { %v532_v33 = vpop.xlane.xlu2 %531 }
 0x251   : > { %v533_v34 = vsub.f32 %v529_v25, %v532_v33  ;;  %v1005_v33 = vld [vmem:[%s1551_s29] sm:$0xff]  ;;  %s1697_s29 = sld [smem:[#allocation13_spill]] }
 0x252   : > { %720 = vmatpush.bf16.msrb.mxu3 %v1005_v33 }
 0x253   : > { %v534_v35 = vmul.f32 1.442695, %v533_v34  ;;  %v645_v34 = vperm.slane %v1563_v5, 4 }
 0x255   : > { %1125 = vpow2.f32 %v534_v35 }
 0x257   : > { %s992_s18 = sshll.u32 %s1697_s29, 3 }
 0x258   : > { %s765_s14 = scalar_lea.hbm %s1698_s12, %s992_s18 }
 0x259   : > { %s769_s9 = sshll.u32 %s765_s14, 4  ;;  %s770_s9 = int_to_ptr.hbm [resolvable:$true] %s769_s9 }
 0x25a   : > { %s1211_s28 = sshra.s32 %s770_s9, 4  ;;  %s1212_s28 = int_to_ptr.hbm [resolvable:$true] %s1211_s28 }
 0x25b   : > { %v1126_v36 = vpop.eup %1125  ;;  %s1213_s17 = scalar_lea.hbm %s1212_s28, 8  ;;  %p1218_p4 = scmp.lt.s32.totalorder %s1212_s28, %s1698_s12 }
 0x25c   : > { %v536_v37 = vsel %vm470_vm4, %v1126_v36, 0.0  ;;  %p1214_p0 = scmp.ne.s32.totalorder %s1212_s28, %s1213_s17  ;;  %p1219_p7 = scmp.lt.s32.totalorder %s1217_s27, %s1213_s17 }
 0x25d   : > { %537 = vadd.xlane.f32.xlu2 %v536_v37 }
 0x25e   : > { %p1215_p2 = pnand %p1214_p0, %p1447_p8  ;;  %p1220_p11 = por %p1219_p7, %p1218_p4 }
 0x260   : > { %p1216_p5 = pneg %p1215_p2 }
 0x262   : > { %p1221_p12 = pnand %p1220_p11, %p1216_p5 }
 0x2c2   : > { %v479_v38 = vpop.xlane.xlu2 %478 }
 0x2c3   : > { %1127 = vrcp.f32 %v479_v38 }
 0x2c9   : > { %v1128_v39 = vpop.eup %1127 }
 0x2ca   : > { %v481_v40 = vmul.f32 %v1128_v39, %v1124_v31 }
 0x2cc   : > { %v482_v41 = vpack.c.bf16 %v481_v40, %v481_v40  ;;  %v684_v40 = vperm.slane %v1563_v5, 5 }
 0x2ce   : > { %953 = vmatmul.msk.bf16.vlgmr.msra.gmra.mxu2 %vm470_vm4, %v482_v41 }
 0x2d0   : > { %v538_v42 = vpop.xlane.xlu2 %537 }
 0x2d1   : > { %1129 = vrcp.f32 %v538_v42 }
 0x2d2   : > { %1131 = vrcp.f32 %v1331_v63  ;;  %v751_v63 = vperm.slane %v1563_v5, 7 }
 0x2d7   : > { %v1130_v43 = vpop.eup %1129 }
 0x2d8   : > { %v540_v44 = vmul.f32 %v1130_v43, %v1126_v36  ;;  %v1132_v0 = vpop.eup %1131 }
 0x2d9   : > { %v611_v1 = vmul.f32 32.0, %v1132_v0  ;;  %vm615_vm5 = vweird.f32 %v1132_v0 }
 0x2da   : > { %v541_v45 = vpack.c.bf16 %v540_v44, %v540_v44 }
 0x2db   : > { %v612_v2 = vsub.f32 1.0, %v611_v1 }
 0x2dd   : > { %v613_v4 = vmul.f32 %v1132_v0, %v612_v2 }
 0x2de   : > { %955 = vmatmul.msk.bf16.vlgmr.msrb.gmra.mxu2 %vm470_vm4, %v541_v45 }
 0x2df   : > { %v614_v6 = vadd.f32 %v1132_v0, %v613_v4 }
 0x2e1   : > { %v616_v7 = vsel %vm615_vm5, %v1132_v0, %v614_v6 }
 0x351   : > { %v501_v48 = vpop.f32.mrf.mxu2 }
 0x352   : > { %505 = vst.msk [vmem:[#allocation2] sm:$0xff] %vm449_vm2, %v501_v48 }
 0x359   : > { %v503_v49 = vpop.f32.mrf.mxu2 }
 0x361   : > { %v559_v50 = vpop.f32.mrf.mxu2 }
 0x362   : > { %563 = vst.msk [vmem:[#allocation2 + $0x8] sm:$0xff] %vm449_vm2, %v559_v50 }
 0x369   : > { %v561_v51 = vpop.f32.mrf.mxu2  ;;  %v566_v52 = vld [vmem:[#allocation2 + $0x1] ss:$2 sm:$0xff]  ;;  %v564_v54 = vld [vmem:[#allocation2] ss:$2 sm:$0xff] }
 0x36a   : > { %568 = vrot.lane.b32.xlu2 %v566_v52, %s1330_s6 }
 0x3c4   : > { %v569_v53 = vpop.permute.xlu2 %568 }
 0x3c5   : > { %v571_v55 = vsel %vm449_vm2, %v564_v54, %v569_v53 }
 0x3c6   : > { %v576_v56 = vpack.c.bf16 %v571_v55, %v571_v55 }
 0x3c8   : > { %964 = vmatmul.msk.bf16.vlgmr.msrb.gmra.mxu0 %vm428_vm1, %v576_v56 }
 0x445   : > { %v602_v58 = vpop.f32.mrf.mxu0 }
 0x446   : > { %v603_v59 = vadd.f32 %v602_v58, %v577_v57 }
 0x448   : > { %v606_v60 = vadd.f32 %v603_v59, %v1558_v3 }
 0x44a   : > { %v607_v61 = vsel %vm428_vm1, %v606_v60, 0.0 }
 0x44b   : > { %608 = vadd.xlane.f32.xlu0 %v607_v61 }
 0x44d   : > { %v604_v62 = vpop.f32.mrf.mxu0 }
 0x4be   : > { %v609_v8 = vpop.xlane.xlu0 %608 }
 0x4bf   : > { %v617_v9 = vmul.f32 %v616_v7, %v609_v8 }
 0x4c1   : > { %v618_v3 = vsub.f32 %v606_v60, %v617_v9  ;;  %v749_v60 = vperm.slane %v1563_v5, 6 }
 0x4c3   : > { %v619_v10 = vmul.f32 %v618_v3, %v618_v3 }
 0x4c5   : > { %v620_v11 = vsel %vm428_vm1, %v619_v10, 0.0 }
 0x4c6   : > { %621 = vadd.xlane.f32.xlu2 %v620_v11 }
 0x539   : > { %v622_v15 = vpop.xlane.xlu2 %621 }
 0x53a   : > { %v623_v16 = vmul.f32 %v622_v15, %v616_v7 }
 0x53c   : > { %v624_v18 = vadd.f32 1e-05, %v623_v16 }
 0x53e   : > { %1133 = vrsqrt.f32 %v624_v18  ;;  %vm631_vm7 = vweird.f32 %v624_v18 }
 0x544   : > { %v1134_v20 = vpop.eup %1133 }
 0x545   : > { %v626_v21 = vmul.f32 %v1134_v20, %v624_v18  ;;  %vm632_vm6 = vweird.f32 %v1134_v20 }
 0x546   : > { %vm633_vm8 = vmor %vm631_vm7, %vm632_vm6 }
 0x547   : > { %v627_v22 = vmul.f32 %v1134_v20, %v626_v21 }
 0x549   : > { %v628_v23 = vmul.f32 0.5, %v627_v22 }
 0x54b   : > { %v629_v24 = vsub.f32 1.5, %v628_v23 }
 0x54d   : > { %v630_v25 = vmul.f32 %v1134_v20, %v629_v24 }
 0x54f   : > { %v634_v27 = vsel %vm633_vm8, %v1134_v20, %v630_v25 }
 0x550   : > { %v635_v28 = vmul.f32 %v634_v27, %v618_v3 }
 0x552   : > { %v637_v30 = vmul.f32 %v636_v26, %v635_v28 }
 0x554   : > { %v639_v31 = vadd.f32 %v638_v29, %v637_v30 }
 0x556   : > { %v644_v32 = vpack.c.bf16 %v639_v31, %v639_v31 }
 0x558   : > { %973 = vmatmul.msk.bf16.vlgmr.msrb.gmra.mxu1 %vm428_vm1, %v644_v32 }
 0x5d5   : > { %v670_v35 = vpop.f32.mrf.mxu1 }
 0x5d6   : > { %v671_v36 = vadd.f32 %v670_v35, %v645_v34 }
 0x5d8   : > { %v674_v37 = vmax.f32 %v671_v36, 0.0 }
 0x5da   : > { %v683_v38 = vpack.c.bf16 %v674_v37, %v674_v37 }
 0x5dc   : > { %990 = vmatmul.msk.bf16.vlgmr.msrb.gmra.mxu3 %vm709_vm9, %v683_v38 }
 0x5dd   : > { %v672_v39 = vpop.f32.mrf.mxu1 }
 0x65f   : > { %v722_v41 = vpop.f32.mrf.mxu3 }
 0x660   : > { %v723_v42 = vadd.f32 %v722_v41, %v684_v40 }
 0x662   : > { %v726_v43 = vadd.f32 %v723_v42, %v639_v31 }
 0x664   : > { %v727_v44 = vsel %vm428_vm1, %v726_v43, 0.0 }
 0x665   : > { %728 = vadd.xlane.f32.xlu1 %v727_v44 }
 0x667   : > { %v724_v45 = vpop.f32.mrf.mxu3 }
 0x6d8   : > { %v729_v46 = vpop.xlane.xlu1 %728 }
 0x6d9   : > { %v730_v47 = vmul.f32 %v729_v46, %v616_v7 }
 0x6db   : > { %v731_v48 = vsub.f32 %v726_v43, %v730_v47 }
 0x6dd   : > { %v732_v49 = vmul.f32 %v731_v48, %v731_v48 }
 0x6df   : > { %v733_v50 = vsel %vm428_vm1, %v732_v49, 0.0 }
 0x6e0   : > { %734 = vadd.xlane.f32.xlu1 %v733_v50 }
 0x753   : > { %v735_v51 = vpop.xlane.xlu1 %734 }
 0x754   : > { %v736_v52 = vmul.f32 %v735_v51, %v616_v7 }
 0x756   : > { %v737_v53 = vadd.f32 1e-05, %v736_v52 }
 0x758   : > { %1135 = vrsqrt.f32 %v737_v53  ;;  %vm744_vm11 = vweird.f32 %v737_v53 }
 0x75e   : > { %v1136_v54 = vpop.eup %1135 }
 0x75f   : > { %v739_v55 = vmul.f32 %v1136_v54, %v737_v53  ;;  %vm745_vm10 = vweird.f32 %v1136_v54 }
 0x760   : > { %vm746_vm12 = vmor %vm744_vm11, %vm745_vm10 }
 0x761   : > { %v740_v56 = vmul.f32 %v1136_v54, %v739_v55 }
 0x763   : > { %v741_v57 = vmul.f32 0.5, %v740_v56 }
 0x765   : > { %v742_v58 = vsub.f32 1.5, %v741_v57 }
 0x767   : > { %v743_v59 = vmul.f32 %v1136_v54, %v742_v58 }
 0x769   : > { %v747_v61 = vsel %vm746_vm12, %v1136_v54, %v743_v59 }
 0x76a   : > { %v748_v62 = vmul.f32 %v747_v61, %v731_v48 }
 0x76c   : > { %v750_v0 = vmul.f32 %v749_v60, %v748_v62 }
 0x76e   : > { %v752_v1 = vadd.f32 %v751_v63, %v750_v0 }
 0x770   : > { %753 = vst.msk [vmem:[%s1553_s11] sm:$0xff] %vm428_vm1, %v752_v1 }
 0x771   : > { %1224 = shalt.err (!%p1221_p12)
}
 0x772   : > { %1013 = dma.vmem_to_hbm [thread:$0]  (%p1447_p8), %s768_s19, 128, %s770_s9, %s755_s4  }
 0x773 PF: > { %s1700_s10 = sld [smem:[#allocation12_spill]]  ;;  %p1027_p13 = scmp.ge.s32.totalorder %s1323_s7, 2 }
 0x775   : > { %p1023_p1 = pnand %p1027_p13, %p1451_p9 }
 0x777   : > { %p1024_p3 = pneg %p1023_p1 }
 0x779   : > { %s781_s0 = sand.u32 1, %s1700_s10  }
 0x77a   : > { %s782_s6 = scalar_lea.sflag [#allocation5], %s781_s0 }
 0x77b   : > { %1278 = dma.done.wait (%p1024_p3), %s782_s6, 128  }
 0x77c   : > { %1280 = vsyncadd (%p1024_p3), %s782_s6, 4294967168  ;;  %s25_s7 = sadd.s32 1, %s1323_s7   ;;  %s1702_s27 = sld [smem:[#allocation14_spill]] }
 0x77d   : > { %p22_p10 = scmp.ge.s32.totalorder %s25_s7, 6   ;;  %s1703_s28 = sld [smem:[#allocation15_spill]] }
 0x77e   : > { %s1704_s29 = sld [smem:[#allocation18_spill]]  ;;  %s1706_s21 = smov %s1287_s22 }
 0x77f   : > { %s1705_s30 = sld [smem:[#allocation19_spill]]  ;;  %s1707_s22 = smov %s1291_s23 }
 0x780   : > { %s1708_s23 = smov %s1500_s8  ;;  %s1709_s24 = smov %s1299_s25 }
 0x781   : > { %s1710_s25 = smov %s1303_s26  ;;  %s1711_s26 = smov %s1508_s16 }
 0x782   :  { %24 = sbr.rel (!%p22_p10) target bundleno = 16 (0x10), region = 119 }
 0x787   :  { %788 = vsyncpa [#allocation4], 1 }
 0x788   :  { %790 = vsyncpa [#allocation4 + $0x1], 1 }
 0x789   :  { %791 = vsyncpa [#allocation7], 1 }
 0x78a   :  { %793 = vsyncpa [#allocation7 + $0x1], 1 }
 0x78b   :  { %794 = vsyncpa [#allocation5], 1 }
 0x78c   :  { %796 = vsyncpa [#allocation5 + $0x1], 1 }

</bundles_post_ra>
